<compile_context>
chip_gen: v7x
topology: tpu7x:2x2x1
jax: 0.10.0
libtpu: 0.0.40
codegen_flags: <defaults>
</compile_context>

<pallas_src>
import math
import functools

import jax
import jax.numpy as jnp
from jax import lax
from jax.experimental import pallas as pl
from jax.experimental.pallas import tpu as pltpu


# ----------------------------------------------------------------------------
# Stage 1: fused K|V projection.  K stored transposed, outputs bf16.
# ----------------------------------------------------------------------------
def _kv_kernel(inter_dim, h_ref, wkv_ref, bkv_ref, kt_ref, v_ref):
    kv = jnp.dot(h_ref[...], wkv_ref[...],
                 preferred_element_type=jnp.float32) + bkv_ref[...]
    kt_ref[...] = kv[:, :inter_dim].T.astype(jnp.bfloat16)   # (inter, tm)
    v_ref[...] = kv[:, inter_dim:].astype(jnp.bfloat16)      # (tm, inter)


# ----------------------------------------------------------------------------
# Stage 2: flash-style retention + feature MLPs + PReLU + GroupNorm.
# Grid = (row tiles [parallel], key/value tiles [arbitrary]).
# ----------------------------------------------------------------------------
def _paret_kernel(inter_dim, hidden_dim, out_dim, num_groups, eps,
                  h_ref, kt_ref, v_ref, d_ref, hp_ref,
                  wq_ref, wrf_ref, wcf_ref, wpr_ref, wpc_ref,
                  pvec_ref, g_ref, gt_ref,
                  out_ref,
                  q_sc, m_sc, l_sc, acc_sc):
    f32, bf16 = jnp.float32, jnp.bfloat16
    H, C = hidden_dim, out_dim
    kv_i = pl.program_id(1)
    n_kv = pl.num_programs(1)

    # -- first kv tile of this row tile: project Q once, reset running stats --
    @pl.when(kv_i == 0)
    def _():
        bq = pvec_ref[:, 0:inter_dim]                      # 1/sqrt(inter) folded in
        q = jnp.dot(h_ref[...], wq_ref[...], preferred_element_type=f32) + bq
        q_sc[...] = q.astype(bf16)
        m_sc[...] = jnp.full_like(m_sc, -jnp.inf)
        l_sc[...] = jnp.zeros_like(l_sc)
        acc_sc[...] = jnp.zeros_like(acc_sc)

    # -- online-softmax update over this key/value tile -----------------------
    s = jnp.dot(q_sc[...], kt_ref[...], preferred_element_type=f32)    # (tm, tk)
    s = s * d_ref[...].astype(f32)                                      # D mask
    m_new = jnp.maximum(m_sc[...], jnp.max(s, axis=-1, keepdims=True))
    corr = jnp.exp(m_sc[...] - m_new)
    p = jnp.exp(s - m_new)
    l_sc[...] = corr * l_sc[...] + jnp.sum(p, axis=-1, keepdims=True)
    acc_sc[...] = corr * acc_sc[...] + jnp.dot(p.astype(bf16), v_ref[...],
                                               preferred_element_type=f32)
    m_sc[...] = m_new

    # -- last kv tile: normalize, MLPs, PReLU, GroupNorm ----------------------
    @pl.when(kv_i == n_kv - 1)
    def _():
        pvec = pvec_ref[...]
        o = inter_dim
        brf   = pvec[:, o:o + H]
        bcf   = pvec[:, o + H:o + 2 * H]
        bp    = pvec[:, o + 2 * H:o + 2 * H + C]
        alpha = pvec[:, o + 2 * H + C:o + 2 * H + 2 * C]
        gnw   = pvec[:, o + 2 * H + 2 * C:o + 2 * H + 3 * C]
        gnb   = pvec[:, o + 2 * H + 3 * C:o + 2 * H + 4 * C]

        # softmax normalization (EUP approximate reciprocal)
        h_ret = acc_sc[...] * pl.reciprocal(l_sc[...], approx=True)

        # ret_feat + exact (erf) GELU
        h_ret = jnp.dot(h_ret.astype(bf16), wrf_ref[...],
                        preferred_element_type=f32) + brf
        h_ret = 0.5 * h_ret * (1.0 + lax.erf(h_ret * (1.0 / math.sqrt(2.0))))

        # cat_feat on h_prime
        h_cat = jnp.dot(hp_ref[...], wcf_ref[...],
                        preferred_element_type=f32) + bcf

        # ret_proj over concat([h_ret, h_cat]) == split matmul (no concat copy)
        x = (jnp.dot(h_ret.astype(bf16), wpr_ref[...], preferred_element_type=f32)
             + jnp.dot(h_cat.astype(bf16), wpc_ref[...], preferred_element_type=f32)
             + bp)

        # PReLU (per-output-channel alpha)
        x = jnp.where(x >= 0.0, x, alpha * x)

        # GroupNorm: two f32 MXU pushes for the group reductions, two small
        # NN matmuls for the per-channel broadcast of scale / shift.
        gs = C // num_groups
        gsum = jnp.dot(x, g_ref[...], preferred_element_type=f32)        # (tm, ng)
        gsq = jnp.dot(x * x, g_ref[...], preferred_element_type=f32)     # (tm, ng)
        mean = gsum * (1.0 / gs)
        var = jnp.maximum(gsq * (1.0 / gs) - mean * mean, 0.0)
        inv = lax.rsqrt(var + eps)
        scale_c = jnp.dot(inv, gt_ref[...], preferred_element_type=f32)         # (tm, C)
        shift_c = jnp.dot(mean * inv, gt_ref[...], preferred_element_type=f32)  # (tm, C)
        out_ref[...] = (x * scale_c - shift_c) * gnw + gnb


# ----------------------------------------------------------------------------
# Generation-aware tiling / VMEM limits.
# ----------------------------------------------------------------------------
def _pick_config(N):
    try:
        kind = jax.devices()[0].device_kind.lower()
    except Exception:
        kind = ""
    if "v6" in kind:                      # v6e: 128 MiB VMEM, 256-wide MXU
        tm_pref, tk_pref, vmem = 256, 512, 96 * 1024 * 1024
    elif "v7" in kind or "7x" in kind:    # v7x: 64 MiB VMEM -> small working set
        tm_pref, tk_pref, vmem = 128, 256, 48 * 1024 * 1024
    elif "v5" in kind:                    # v5e: mem-bound; raise 16 MiB scoped default
        tm_pref, tk_pref, vmem = 128, 512, 64 * 1024 * 1024
    else:                                 # unknown generation: conservative defaults
        tm_pref, tk_pref, vmem = 128, 256, None

    def fit(pref):
        t = max(128, (min(pref, N) // 128) * 128)
        while N % t:
            t -= 128
        return t

    return fit(tm_pref), fit(tk_pref), vmem


# ----------------------------------------------------------------------------
# Wrapper
# ----------------------------------------------------------------------------
def parallel_retention(h, D, h_prime, params, *, num_groups=16, eps=1e-5):
    N, in_dim = h.shape
    inter_dim = params["wq"].shape[1]
    hidden_dim = params["wrf"].shape[1]
    out_dim = params["wp"].shape[1]
    assert N % 128 == 0, "N must be a multiple of 128"
    assert out_dim % num_groups == 0, "out_dim must be divisible by num_groups"
    assert params["wp"].shape[0] == 2 * hidden_dim

    tm, tk, vmem_bytes = _pick_config(N)
    n_rows, n_kv = N // tm, N // tk

    f32, bf16 = jnp.float32, jnp.bfloat16
    # bf16 MXU operands; accumulation stays f32 inside the kernels.
    h_b = h.astype(bf16)
    hp_b = h_prime.astype(bf16)
    d_b = D.astype(bf16)          # TODO(synk): if D is a decay mask of indices, generate it in-kernel instead of streaming it.
    scale = 1.0 / math.sqrt(inter_dim)
    wq = (params["wq"] * scale).astype(bf16)                       # scale folded in
    wkv = jnp.concatenate([params["wk"], params["wv"]], axis=1).astype(bf16)
    bkv = jnp.concatenate([params["bk"], params["bv"]], axis=1).astype(f32)
    wrf = params["wrf"].astype(bf16)
    wcf = params["wcf"].astype(bf16)
    wpr = params["wp"][:hidden_dim].astype(bf16)
    wpc = params["wp"][hidden_dim:].astype(bf16)
    # packed small-parameter row (one DMA), f32
    pvec = jnp.concatenate(
        [params["bq"] * scale, params["brf"], params["bcf"], params["bp"],
         params["alpha"], params["gnw"], params["gnb"]], axis=1).astype(f32)
    pv_len = inter_dim + 2 * hidden_dim + 4 * out_dim
    gsize = out_dim // num_groups
    G = jnp.repeat(jnp.eye(num_groups, dtype=f32), gsize, axis=0)   # (C, ng)
    Gt = G.T                                                        # (ng, C)

    cp_kwargs = {} if vmem_bytes is None else dict(vmem_limit_bytes=vmem_bytes)
    cparams1 = pltpu.CompilerParams(dimension_semantics=("parallel",), **cp_kwargs)
    cparams2 = pltpu.CompilerParams(dimension_semantics=("parallel", "arbitrary"),
                                    **cp_kwargs)

    # -- stage 1: K^T / V projection (bf16 outputs, K pre-transposed) ---------
    kt, v = pl.pallas_call(
        functools.partial(_kv_kernel, inter_dim),
        out_shape=(jax.ShapeDtypeStruct((inter_dim, N), bf16),
                   jax.ShapeDtypeStruct((N, inter_dim), bf16)),
        grid=(n_rows,),
        in_specs=[pl.BlockSpec((tm, in_dim), lambda i: (i, 0)),
                  pl.BlockSpec((in_dim, 2 * inter_dim), lambda i: (0, 0)),
                  pl.BlockSpec((1, 2 * inter_dim), lambda i: (0, 0))],
        out_specs=(pl.BlockSpec((inter_dim, tm), lambda i: (0, i)),
                   pl.BlockSpec((tm, inter_dim), lambda i: (i, 0))),
        compiler_params=cparams1,
    )(h_b, wkv, bkv)

    # -- advisory cost estimate for the XLA scheduler --------------------------
    flops = 2 * N * (in_dim * 3 * inter_dim + 2 * N * inter_dim
                     + inter_dim * hidden_dim + out_dim * hidden_dim
                     + 2 * hidden_dim * out_dim + 4 * out_dim * num_groups)
    transcendentals = N * (N + hidden_dim + 2 * out_dim)
    bytes_accessed = (2 * (h_b.size + hp_b.size + d_b.size + kt.size + v.size
                           + wq.size + wkv.size + wrf.size + wcf.size
                           + wpr.size + wpc.size)
                      + 4 * (N * out_dim + pv_len + 2 * G.size))

    # -- stage 2: flash-style retention + MLPs + PReLU + GroupNorm -------------
    kernel = functools.partial(_paret_kernel, inter_dim, hidden_dim, out_dim,
                               num_groups, eps)
    return pl.pallas_call(
        kernel,
        out_shape=jax.ShapeDtypeStruct((N, out_dim), f32),
        grid=(n_rows, n_kv),
        in_specs=[
            pl.BlockSpec((tm, in_dim), lambda i, k: (i, 0)),            # h rows (for Q)
            pl.BlockSpec((inter_dim, tk), lambda i, k: (0, k)),         # K^T tile
            pl.BlockSpec((tk, inter_dim), lambda i, k: (k, 0)),         # V tile
            pl.BlockSpec((tm, tk), lambda i, k: (i, k)),                # D tile
            pl.BlockSpec((tm, out_dim), lambda i, k: (i, 0)),           # h_prime rows
            pl.BlockSpec((in_dim, inter_dim), lambda i, k: (0, 0)),     # wq (scaled)
            pl.BlockSpec((inter_dim, hidden_dim), lambda i, k: (0, 0)), # wrf
            pl.BlockSpec((out_dim, hidden_dim), lambda i, k: (0, 0)),   # wcf
            pl.BlockSpec((hidden_dim, out_dim), lambda i, k: (0, 0)),   # wpr
            pl.BlockSpec((hidden_dim, out_dim), lambda i, k: (0, 0)),   # wpc
            pl.BlockSpec((1, pv_len), lambda i, k: (0, 0)),             # packed params
            pl.BlockSpec((out_dim, num_groups), lambda i, k: (0, 0)),   # G one-hot
            pl.BlockSpec((num_groups, out_dim), lambda i, k: (0, 0)),   # G^T
        ],
        out_specs=pl.BlockSpec((tm, out_dim), lambda i, k: (i, 0)),
        scratch_shapes=[pltpu.VMEM((tm, inter_dim), bf16),   # Q (MXU operand)
                        pltpu.VMEM((tm, 1), f32),            # running max m
                        pltpu.VMEM((tm, 1), f32),            # running denom l
                        pltpu.VMEM((tm, inter_dim), f32)],   # attn @ V accumulator
        compiler_params=cparams2,
        cost_estimate=pl.CostEstimate(flops=int(flops),
                                      transcendentals=int(transcendentals),
                                      bytes_accessed=int(bytes_accessed)),
    )(h_b, kt, v, d_b, hp_b, wq, wrf, wcf, wpr, wpc, pvec, G, Gt)


# ----------------------------------------------------------------------------
# Synthetic parameters (match nn.Linear / PReLU / GroupNorm defaults), f32.
# ----------------------------------------------------------------------------
def init_params(key, in_dim, inter_dim, hidden_dim, out_dim):
    def lin(k, fan_in, fan_out):
        kw, kb = jax.random.split(k)
        bound = 1.0 / math.sqrt(fan_in)
        w = jax.random.uniform(kw, (fan_in, fan_out), jnp.float32, -bound, bound)
        b = jax.random.uniform(kb, (1, fan_out), jnp.float32, -bound, bound)
        return w, b

    keys = jax.random.split(key, 6)
    wq, bq = lin(keys[0], in_dim, inter_dim)
    wk, bk = lin(keys[1], in_dim, inter_dim)
    wv, bv = lin(keys[2], in_dim, inter_dim)
    wrf, brf = lin(keys[3], inter_dim, hidden_dim)
    wcf, bcf = lin(keys[4], out_dim, hidden_dim)
    wp, bp = lin(keys[5], 2 * hidden_dim, out_dim)
    return dict(wq=wq, bq=bq, wk=wk, bk=bk, wv=wv, bv=bv,
                wrf=wrf, brf=brf, wcf=wcf, bcf=bcf, wp=wp, bp=bp,
                alpha=jnp.full((1, out_dim), 0.25, jnp.float32),   # PReLU default
                gnw=jnp.ones((1, out_dim), jnp.float32),           # GroupNorm affine
                gnb=jnp.zeros((1, out_dim), jnp.float32))


# ----------------------------------------------------------------------------
# Pure-JAX f32 reference (mirrors the PyTorch module exactly)
# ----------------------------------------------------------------------------
def reference(h, D, h_prime, p, *, num_groups=16, eps=1e-5):
    inter = p["wq"].shape[1]
    Q = h @ p["wq"] + p["bq"]
    K = h @ p["wk"] + p["bk"]
    V = h @ p["wv"] + p["bv"]
    attn = jax.nn.softmax(D * ((Q @ K.T) / math.sqrt(inter)), axis=-1)
    h_ret = attn @ V
    h_ret = jax.nn.gelu(h_ret @ p["wrf"] + p["brf"], approximate=False)
    h_cat = h_prime @ p["wcf"] + p["bcf"]
    x = jnp.concatenate([h_ret, h_cat], axis=-1) @ p["wp"] + p["bp"]
    x = jnp.where(x >= 0.0, x, p["alpha"] * x)
    N, C = x.shape
    xg = x.reshape(N, num_groups, C // num_groups)
    mean = xg.mean(-1, keepdims=True)
    var = ((xg - mean) ** 2).mean(-1, keepdims=True)
    x = ((xg - mean) / jnp.sqrt(var + eps)).reshape(N, C)
    return x * p["gnw"] + p["gnb"]


if __name__ == "__main__":
    # Lane-dense shapes; N=1024 so every generation's tiling gives >=2 row
    # tiles and >=2 key/value tiles (exercises the online-softmax path).
    N, in_dim, inter_dim, hidden_dim, out_dim, num_groups = 1024, 128, 128, 128, 128, 16

    key = jax.random.PRNGKey(0)
    k_h, k_D, k_hp, k_p = jax.random.split(key, 4)
    h = jax.random.normal(k_h, (N, in_dim), jnp.float32)
    D = jax.random.normal(k_D, (N, N), jnp.float32)
    h_prime = jax.random.normal(k_hp, (N, out_dim), jnp.float32)
    params = init_params(k_p, in_dim, inter_dim, hidden_dim, out_dim)

    out = jax.block_until_ready(
        parallel_retention(h, D, h_prime, params, num_groups=num_groups))
    ref = jax.block_until_ready(
        reference(h, D, h_prime, params, num_groups=num_groups))

    assert out.shape == (N, out_dim)
    # bf16 MXU operands (f32 accumulation) -> tolerance loosened vs f32 reference.
    assert jnp.allclose(out, ref, rtol=5e-2, atol=5e-2), "kernel vs reference mismatch"
    print("KERNEL_OK")
</pallas_src>

<mosaic_0001>
module attributes {stable_mosaic.version = 11 : i64} {
  func.func @_kv_kernel(%arg0: i32, %arg1: memref<128x128xbf16, #tpu.memory_space<vmem>>, %arg2: memref<128x256xbf16, #tpu.memory_space<vmem>>, %arg3: memref<1x256xf32, #tpu.memory_space<vmem>>, %arg4: memref<128x128xbf16, #tpu.memory_space<vmem>>, %arg5: memref<128x128xbf16, #tpu.memory_space<vmem>>) attributes {dimension_semantics = [#tpu.dimension_semantics<parallel>], iteration_bounds = array<i64: 8>, scalar_prefetch = 0 : i64, scratch_operands = 0 : i64, tpu.core_type = #tpu.core_type<tc>, window_params = [{transform_indices = @transform_0, window_bounds = array<i64: 128, 128>}, {pipeline_mode = #tpu.pipeline_mode<synchronous>, transform_indices = @transform_1, window_bounds = array<i64: 128, 256>}, {pipeline_mode = #tpu.pipeline_mode<synchronous>, transform_indices = @transform_2, window_bounds = array<i64: 1, 256>}, {transform_indices = @transform_3, window_bounds = array<i64: 128, 128>}, {transform_indices = @transform_4, window_bounds = array<i64: 128, 128>}]} {
    %c0 = arith.constant 0 : index
    %c0_0 = arith.constant 0 : index
    %0 = vector.load %arg1[%c0, %c0_0] : memref<128x128xbf16, #tpu.memory_space<vmem>>, vector<128x128xbf16>
    %c0_1 = arith.constant 0 : index
    %c0_2 = arith.constant 0 : index
    %1 = vector.load %arg2[%c0_1, %c0_2] : memref<128x256xbf16, #tpu.memory_space<vmem>>, vector<128x256xbf16>
    %cst = arith.constant dense<0.000000e+00> : vector<128x256xf32>
    %2 = tpu.matmul %0, %1, %cst {dimension_numbers = #tpu.dot_dimension_numbers<[1], [0], [0], [1], [0, 0, 1, 1], [], []>} : vector<128x128xbf16>, vector<128x256xbf16>, vector<128x256xf32> -> vector<128x256xf32>
    %c0_3 = arith.constant 0 : index
    %c0_4 = arith.constant 0 : index
    %3 = vector.load %arg3[%c0_3, %c0_4] : memref<1x256xf32, #tpu.memory_space<vmem>>, vector<1x256xf32>
    %4 = vector.broadcast %3 : vector<1x256xf32> to vector<128x256xf32>
    %5 = arith.addf %2, %4 : vector<128x256xf32>
    %6 = vector.extract_strided_slice %5 {offsets = [0, 0], sizes = [128, 128], strides = [1, 1]} : vector<128x256xf32> to vector<128x128xf32>
    %7 = tpu.transpose %6, [1, 0] : vector<128x128xf32> -> vector<128x128xf32>
    %8 = arith.truncf %7 : vector<128x128xf32> to vector<128x128xbf16>
    %c0_5 = arith.constant 0 : index
    %c0_6 = arith.constant 0 : index
    %9 = vector.load %arg4[%c0_5, %c0_6] : memref<128x128xbf16, #tpu.memory_space<vmem>>, vector<128x128xbf16>
    tpu.vector_store %arg4[%c0_5, %c0_6], %8 {strides = array<i32>} : memref<128x128xbf16, #tpu.memory_space<vmem>>, vector<128x128xbf16>,
    %10 = vector.extract_strided_slice %5 {offsets = [0, 128], sizes = [128, 128], strides = [1, 1]} : vector<128x256xf32> to vector<128x128xf32>
    %11 = arith.truncf %10 : vector<128x128xf32> to vector<128x128xbf16>
    %c0_7 = arith.constant 0 : index
    %c0_8 = arith.constant 0 : index
    %12 = vector.load %arg5[%c0_7, %c0_8] : memref<128x128xbf16, #tpu.memory_space<vmem>>, vector<128x128xbf16>
    tpu.vector_store %arg5[%c0_7, %c0_8], %11 {strides = array<i32>} : memref<128x128xbf16, #tpu.memory_space<vmem>>, vector<128x128xbf16>,
    return
  }
  func.func @transform_0(%arg0: i32) -> (i32, i32) {
    %c0_i32 = arith.constant 0 : i32
    %c0_i32_0 = arith.constant 0 : i32
    return %arg0, %c0_i32 : i32, i32
  }
  func.func @transform_1(%arg0: i32) -> (i32, i32) {
    %c0_i32 = arith.constant 0 : i32
    %c0_i32_0 = arith.constant 0 : i32
    %c0_i32_1 = arith.constant 0 : i32
    return %c0_i32, %c0_i32_0 : i32, i32
  }
  func.func @transform_2(%arg0: i32) -> (i32, i32) {
    %c0_i32 = arith.constant 0 : i32
    %c0_i32_0 = arith.constant 0 : i32
    %c0_i32_1 = arith.constant 0 : i32
    return %c0_i32, %c0_i32_0 : i32, i32
  }
  func.func @transform_3(%arg0: i32) -> (i32, i32) {
    %c0_i32 = arith.constant 0 : i32
    %c0_i32_0 = arith.constant 0 : i32
    return %c0_i32, %arg0 : i32, i32
  }
  func.func @transform_4(%arg0: i32) -> (i32, i32) {
    %c0_i32 = arith.constant 0 : i32
    %c0_i32_0 = arith.constant 0 : i32
    return %arg0, %c0_i32 : i32, i32
  }
}

</mosaic_0001>

<bundles_post_ra>
// kernel: tpu_custom_call.1
= control target key start
LH: loop header
LB: loop body
LE: loop exit
PB: predicated region body
PF: predicated region fallthrough
CT: control target
= control target key end

     0   :  { %10 = vsyncpa [#allocation3], 0  ;;  %s1710_s0 = inlined_call_operand.hbm [shape: bf16[1024,128], index: 0, kind: input, shape index: {}]   ;;  %s1711_s1 = inlined_call_operand.hbm [shape: bf16[128,256], index: 1, kind: input, shape index: {}]   ;;  %s1712_s2 = inlined_call_operand.vmem [shape: f32[1,256], index: 2, kind: input, shape index: {}]   ;;  %s1713_s3 = inlined_call_operand.hbm [shape: bf16[128,1024], index: 3, kind: output, shape index: {0}]   ;;  %s1714_s4 = inlined_call_operand.hbm [shape: bf16[1024,128], index: 4, kind: output, shape index: {1}]  }
   0x1   :  { %12 = vsyncpa [#allocation3 + $0x1], 0 }
   0x2   :  { %13 = vsyncpa [#allocation6], 0 }
   0x3   :  { %14 = vsyncpa [#allocation4], 0 }
   0x4   :  { %16 = vsyncpa [#allocation4 + $0x1], 0 }
   0x5   :  { %17 = vsyncpa [#allocation9], 0 }
   0x6   :  { %19 = vsyncpa [#allocation9 + $0x1], 0  ;;  %s1391_s15 = smov 0   ;;  %s1393_s16 = smov 0  }
   0x7   :  { %s1395_s17 = smov 0   ;;  %s1397_s18 = smov 0  }
   0x8 LB: > { %s1412_s19 = sadd.s32 4294967295, %s1352_s18   ;;  %s871_s20 = sadd.s32 4294967294, %s1352_s18   ;;  %s1352_s18 = sphi %s1397_s18, %s1733_s18   ;;  %s1348_s17 = sphi %s1395_s17, %s1732_s17   ;;  %s1344_s16 = sphi %s1393_s16, %s1731_s16   ;;  %s1340_s15 = sphi %s1391_s15, %s1730_s15  }
   0x9   : > { %p45_p0 = scmp.ne.s32.totalorder %s1344_s16, %s1340_s15  ;;  %p1715_p1 = scmp.eq.s32.totalorder %s1412_s19, 0 }
   0xa   : > { %p117_p3 = scmp.eq.s32.totalorder %s871_s20, 7  ;;  %p872_p5 = scmp.ge.s32.totalorder %s1352_s18, 1 }
   0xb   : > { %p1421_p4 = por %p1715_p1, %p45_p0  ;;  %p150_p7 = scmp.lt.s32.totalorder %s1352_s18, 9 }
   0xc   : > { %p1426_p6 = por %p117_p3, %p45_p0  ;;  %s1354_s24 = smov [#allocation5]  }
   0xd   : > { %s1718_s21 = scalar_select %p1421_p4, 1, 0 }
   0xe   : > { %s1719_s22 = scalar_select %p1426_p6, 1, 0 }
   0xf   : > { %p1431_p8 = pnand %p872_p5, %p150_p7  ;;  %s162_s25 = sshll.u32 %s1354_s24, 4  ;;  %s163_s25 = int_to_ptr.vmem [resolvable:$true] %s162_s25 }
  0x10   : > { %s1444_s27 = sadd.s32 1, %s1352_s18   ;;  %s32_s28 = sadd.s32 1, %s1348_s17 }
  0x11   : > { %s1720_s23 = scalar_select %p1431_p8, 1, 0 }
  0x12   : > { %p1100_p9 = pneg %p1431_p8  ;;  %s29_s29 = ssub.s32 %s1352_s18, %s1444_s27 }
  0x13   : > { %s1192_s6 = scalar_lea.hbm %s1711_s1, 2048 }
  0x14   : > { %p1439_p10 = pnand %p1100_p9, %p1715_p1  ;;  %p1193_p11 = scmp.ne.s32.totalorder %s1711_s1, %s1192_s6 }
  0x15   : > { %p1199_p3 = scmp.lt.u32.totalorder %s1192_s6, %s1711_s1 }
  0x16   : > { %p1194_p12 = pneg %p1439_p10 }
  0x18   : > { %p1195_p13 = pnand %p1194_p12, %p1193_p11 }
  0x1a   : > { %p1196_p0 = pneg %p1195_p13 }
  0x1c   : > { %p1201_p5 = pnand %p1199_p3, %p1196_p0 }
  0x1e   : > { %1204 = shalt.err (!%p1201_p5)
}
  0x1f   : > { %s1205_s11 = scalar_lea.vmem %s163_s25, 2048  ;;  %p1213_p2 = scmp.lt.s32.totalorder %s163_s25, %s163_s25 }
  0x20   : > { %p1206_p7 = scmp.ne.s32.totalorder %s163_s25, %s1205_s11  ;;  %p1214_p6 = scmp.lt.s32.totalorder %s1205_s11, %s1205_s11 }
  0x22   : > { %p1208_p9 = pnand %p1206_p7, %p1194_p12  ;;  %p1215_p4 = por %p1214_p6, %p1213_p2 }
  0x24   : > { %p1209_p1 = pneg %p1208_p9 }
  0x26   : > { %p1216_p8 = pnand %p1215_p4, %p1209_p1 }
  0x28   : > { %1219 = shalt.err (!%p1216_p8)
}
  0x29   : > { %s1355_s12 = smov 128   ;;  %s1356_s13 = smov 8  }
  0x2a   : > { %1103 = dma.hbm_to_vmem [thread:$0]  (!%p1439_p10), %s1711_s1, 2048, %s163_s25, [#allocation6], %s1355_s12, %s1355_s12, %s1356_s13  }
  0x2b   : > { %p30_p11 = scmp.eq.s32.totalorder %s29_s29, 0  ;;  %p39_p2 = scmp.ne.s32.totalorder %s1348_s17, %s1344_s16 }
  0x2c   : > { %p40_p1 = scmp.eq.s32.totalorder %s1352_s18, 0  ;;  %p1116_p4 = scmp.lt.s32.totalorder %s1352_s18, 8 }
  0x2d   : > { %s1470_s24 = scalar_select %p30_p11, %s1348_s17, %s32_s28  }
  0x2e   : > { %p41_p6 = por %p40_p1, %p39_p2  ;;  %p1722_p8 = scmp.eq.s32.totalorder %s1412_s19, 7 }
  0x2f   : > { %s179_s5 = sand.u32 1, %s1348_s17   ;;  %s946_s6 = sshll.u32 %s1352_s18, 10 }
  0x30   : > { %p1474_p12 = por %p1722_p8, %p39_p2  ;;  %s875_s7 = sshll.u32 %s179_s5, 6 }
  0x31   : > { %s1483_s9 = scalar_lea.hbm %s1710_s0, %s946_s6  ;;  %s183_s25 = scalar_lea.vmem [#allocation2], %s875_s7 }
  0x32   : > { %s190_s28 = sshll.u32 %s183_s25, 4  ;;  %p1485_p10 = pnand %p1116_p4, %p41_p6  ;;  %s1489_s28 = int_to_ptr.vmem [resolvable:$true] %s190_s28 }
  0x33   : > { %s1491_s10 = scalar_lea.sflag [#allocation3], %s179_s5  ;;  %s1220_s11 = scalar_lea.hbm %s1483_s9, 1024 }
  0x34   : > { %p1221_p13 = scmp.ne.s32.totalorder %s1483_s9, %s1220_s11  ;;  %p1222_p0 = pneg %p1485_p10 }
  0x35   : > { %s1225_s14 = scalar_lea.hbm %s1710_s0, 8192  ;;  %p1226_p7 = scmp.lt.u32.totalorder %s1483_s9, %s1710_s0 }
  0x36   : > { %p1223_p3 = pnand %p1222_p0, %p1221_p13  ;;  %p1227_p9 = scmp.lt.u32.totalorder %s1225_s14, %s1220_s11 }
  0x37   : > { %p1229_p2 = scmp.lt.u32.totalorder %s1220_s11, %s1483_s9 }
  0x38   : > { %p1224_p5 = pneg %p1223_p3  ;;  %p1228_p11 = por %p1227_p9, %p1226_p7 }
  0x3a   : > { %p1230_p1 = por %p1229_p2, %p1228_p11 }
  0x3c   : > { %p1231_p4 = pnand %p1230_p1, %p1224_p5 }
  0x3e   : > { %1234 = shalt.err (!%p1231_p4)
}
  0x3f   : > { %s1235_s5 = scalar_lea.vmem %s1489_s28, 1024  ;;  %s1357_s7 = smov [#allocation2]  }
  0x40   : > { %p1236_p6 = scmp.ne.s32.totalorder %s1489_s28, %s1235_s5  ;;  %s1240_s26 = sshll.u32 %s1357_s7, 4  ;;  %s1241_s26 = int_to_ptr.vmem [resolvable:$false] %s1240_s26 }
  0x41   : > { %s1242_s8 = scalar_lea.vmem %s1241_s26, 2048  ;;  %p1243_p3 = scmp.lt.s32.totalorder %s1489_s28, %s1241_s26 }
  0x42   : > { %p1238_p8 = pnand %p1236_p6, %p1222_p0  ;;  %p1244_p7 = scmp.lt.s32.totalorder %s1242_s8, %s1235_s5 }
  0x44   : > { %p1239_p13 = pneg %p1238_p8  ;;  %p1245_p9 = por %p1244_p7, %p1243_p3 }
  0x46   : > { %p1246_p11 = pnand %p1245_p9, %p1239_p13 }
  0x48   : > { %1249 = shalt.err (!%p1246_p11)
}
  0x49   : > { %s1358_s25 = smov 64   ;;  %s1359_s11 = smov 4  }
  0x4a   : > { %1107 = dma.hbm_to_vmem [thread:$0]  (!%p1485_p10), %s1483_s9, 1024, %s1489_s28, %s1491_s10, %s1358_s25, %s1358_s25, %s1359_s11  }
  0x4b   : > { %p1725_p0 = scmp.ne.s32.totalorder %s1720_s23, 0 }
  0x4c   : > { %s1522_s12 = sand.u32 (!%p1725_p0), 1, %s1344_s16   ;;  %p1726_p5 = scmp.ne.s32.totalorder (!%p1725_p0), %s1718_s21, 0 }
  0x4d   : > { %202 = sbr.rel (%p1725_p0) target bundleno = 542 (0x21e), region = 32  ;;  %s1525_s13 = sshll.u32 (!%p1725_p0), %s1522_s12, 6 }
  0x4e   : > { %s205_s14 = scalar_lea.sflag (!%p1725_p0), [#allocation3], %s1522_s12  ;;  %s1529_s20 = scalar_lea.vmem (!%p1725_p0), [#allocation2], %s1525_s13 }
  0x54   : > { %1323 = dma.done.wait (%p1726_p5), %s205_s14, 1024  }
  0x55   : > { %1325 = vsyncadd (%p1726_p5), %s205_s14, 4294966272  ;;  %p1727_p10 = scmp.eq.s32.totalorder %s1412_s19, 0 }
  0x57   : > { %1327 = dma.done.wait (%p1727_p10), [#allocation6], 2048   ;;  %p1728_p2 = pmov %p1727_p10 }
  0x58   : > { %v1360_v0 = vmov 0   ;;  %v1160_v1 = vld [vmem:[#allocation5 + $0x4] ss:$8 sps:$4 sm:$0xff]   ;;  %v1162_v2 = vld [vmem:[#allocation5] ss:$8 sps:$4 sm:$0xff]   ;;  %v1186_v21 = vld [vmem:[%s1529_s20 + $0x10] sm:$0xff]   ;;  %v279_v25 = vlaneseq }
  0x59   : > { %1329 = vsyncadd (%p1728_p2), [#allocation6], 4294965248  ;;  %449 = vmatprep.mubr.bf16.mxu0 %v1360_v0  ;;  %489 = vmatprep.mubr.bf16.mxu1 %v1360_v0  ;;  %v1163_v3 = vld [vmem:[#allocation5 + $0x14] ss:$8 sps:$4 sm:$0xff]   ;;  %v1165_v4 = vld [vmem:[#allocation5 + $0x10] ss:$8 sps:$4 sm:$0xff]  }
  0x5a   : > { %417 = vmatprep.subr.bf16.mxu0 %v1160_v1  ;;  %1074 = vmatprep.subr.bf16.mxu1 %v1160_v1  ;;  %v1166_v5 = vld [vmem:[#allocation5 + $0x24] ss:$8 sps:$4 sm:$0xff]   ;;  %v1168_v6 = vld [vmem:[#allocation5 + $0x20] ss:$8 sps:$4 sm:$0xff]   ;;  %v1169_v7 = vld [vmem:[#allocation5 + $0x34] ss:$8 sps:$4 sm:$0xff]  }
  0x5b   : > { %418 = vmatpush1.bf16.msra.mxu0 %v1162_v2  ;;  %1082 = vmatpush1.bf16.msra.mxu1 %v1162_v2  ;;  %v1171_v8 = vld [vmem:[#allocation5 + $0x30] ss:$8 sps:$4 sm:$0xff]   ;;  %v1172_v9 = vld [vmem:[#allocation5 + $0x44] ss:$8 sps:$4 sm:$0xff]   ;;  %v1174_v10 = vld [vmem:[#allocation5 + $0x40] ss:$8 sps:$4 sm:$0xff]  }
  0x5c   : > { %419 = vmatprep.subr.bf16.mxu0 %v1163_v3  ;;  %1075 = vmatprep.subr.bf16.mxu1 %v1163_v3  ;;  %v1175_v11 = vld [vmem:[#allocation5 + $0x54] ss:$8 sps:$4 sm:$0xff]   ;;  %v1177_v12 = vld [vmem:[#allocation5 + $0x50] ss:$8 sps:$4 sm:$0xff]   ;;  %v1178_v13 = vld [vmem:[#allocation5 + $0x64] ss:$8 sps:$4 sm:$0xff]  }
  0x5d   : > { %v1180_v14 = vld [vmem:[#allocation5 + $0x60] ss:$8 sps:$4 sm:$0xff]   ;;  %v1181_v15 = vld [vmem:[#allocation5 + $0x74] ss:$8 sps:$4 sm:$0xff]   ;;  %v1183_v16 = vld [vmem:[#allocation5 + $0x70] ss:$8 sps:$4 sm:$0xff]  }
  0x5e   : > { %v1184_v17 = vld [vmem:[%s1529_s20] sm:$0xff]   ;;  %v1185_v19 = vld [vmem:[%s1529_s20 + $0x8] sm:$0xff]   ;;  %v1190_v22 = vld [vmem:[%s1529_s20 + $0x30] sm:$0xff]   ;;  %v280_v26 = vshrl.u32 %v279_v25, 7  ;;  %s1573_s9 = scalar_lea.vmem [#allocation8], %s1525_s13  ;;  %s979_s29 = sshll.u32 %s1412_s19, 10 }
  0x5f   : > { %420 = vmatpush1.bf16.msra.mxu0 %v1165_v4  ;;  %1083 = vmatpush1.bf16.msra.mxu1 %v1165_v4  ;;  %v1188_v18 = vld [vmem:[%s1529_s20 + $0x20] sm:$0xff]   ;;  %v1189_v20 = vld [vmem:[%s1529_s20 + $0x28] sm:$0xff]   ;;  %v1187_v23 = vld [vmem:[%s1529_s20 + $0x18] sm:$0xff]   ;;  %s756_s28 = sshll.u32 %s1573_s9, 4  ;;  %s1618_s5 = scalar_lea.hbm %s1714_s4, %s979_s29  ;;  %s1613_s28 = int_to_ptr.vmem [resolvable:$true] %s756_s28 }
  0x60   : > { %421 = vmatprep.subr.bf16.mxu0 %v1166_v5  ;;  %1076 = vmatprep.subr.bf16.mxu1 %v1166_v5  ;;  %v1191_v24 = vld [vmem:[%s1529_s20 + $0x38] sm:$0xff]   ;;  %v281_v27 = vsub.s32 0, %v280_v26  ;;  %v277_v28 = vld [vmem:[%s1712_s2] sm:$0x3]  ;;  %v285_v29 = vsub.s32 1, %v280_v26  ;;  %s728_s7 = scalar_lea.sflag [#allocation9], %s1522_s12 }
  0x61   : > { %s1250_s26 = scalar_lea.vmem %s1613_s28, 1024  ;;  %s1361_s8 = smov [#allocation8]  }
  0x62   : > { %v1558_v30 = vrot.slane %v277_v28, %v281_v27  ;;  %v1560_v32 = vrot.slane %v277_v28, %v285_v29  ;;  %p1251_p1 = scmp.ne.s32.totalorder %s1613_s28, %s1250_s26  ;;  %s1254_s25 = sshll.u32 %s1361_s8, 4  ;;  %s1255_s25 = int_to_ptr.vmem [resolvable:$false] %s1254_s25 }
  0x63   : > { %422 = vmatpush1.bf16.msra.mxu0 %v1168_v6  ;;  %1084 = vmatpush1.bf16.msra.mxu1 %v1168_v6  ;;  %s1256_s11 = scalar_lea.vmem %s1255_s25, 2048  ;;  %p1257_p8 = scmp.lt.s32.totalorder %s1613_s28, %s1255_s25 }
  0x64   : > { %423 = vmatprep.subr.bf16.mxu0 %v1169_v7  ;;  %1077 = vmatprep.subr.bf16.mxu1 %v1169_v7  ;;  %p1252_p4 = pnand %p1251_p1, %p1474_p12  ;;  %p1258_p13 = scmp.lt.s32.totalorder %s1256_s11, %s1250_s26 }
  0x66   : > { %p1253_p6 = pneg %p1252_p4  ;;  %p1259_p3 = por %p1258_p13, %p1257_p8 }
  0x67   : > { %424 = vmatpush1.bf16.msra.mxu0 %v1171_v8  ;;  %1085 = vmatpush1.bf16.msra.mxu1 %v1171_v8 }
  0x68   : > { %425 = vmatprep.subr.bf16.mxu0 %v1172_v9  ;;  %1078 = vmatprep.subr.bf16.mxu1 %v1172_v9  ;;  %p1260_p7 = pnand %p1259_p3, %p1253_p6 }
  0x6b   : > { %426 = vmatpush1.bf16.msra.mxu0 %v1174_v10  ;;  %1086 = vmatpush1.bf16.msra.mxu1 %v1174_v10 }
  0x6c   : > { %427 = vmatprep.subr.bf16.mxu0 %v1175_v11  ;;  %1079 = vmatprep.subr.bf16.mxu1 %v1175_v11 }
  0x6f   : > { %428 = vmatpush1.bf16.msra.mxu0 %v1177_v12  ;;  %1087 = vmatpush1.bf16.msra.mxu1 %v1177_v12 }
  0x70   : > { %429 = vmatprep.subr.bf16.mxu0 %v1178_v13  ;;  %1080 = vmatprep.subr.bf16.mxu1 %v1178_v13 }
  0x73   : > { %430 = vmatpush1.bf16.msra.mxu0 %v1180_v14  ;;  %1088 = vmatpush1.bf16.msra.mxu1 %v1180_v14 }
  0x74   : > { %431 = vmatprep.subr.bf16.mxu0 %v1181_v15  ;;  %1081 = vmatprep.subr.bf16.mxu1 %v1181_v15 }
  0x77   : > { %432 = vmatpush1.bf16.msra.mxu0 %v1183_v16  ;;  %1089 = vmatpush1.bf16.msra.mxu1 %v1183_v16 }
  0x7a   : > { %450 = vmatmul.mubr.bf16.vlgmr.msra.gmra.mrb[0].mxu0 %v1184_v17  ;;  %490 = vmatmul.mubr.bf16.vlgmr.msra.gmra.mrb[0].mxu1 %v1188_v18 }
  0x7b   : > { %459 = vmatprep.mubr.bf16.mxu0 %v1360_v0  ;;  %499 = vmatprep.mubr.bf16.mxu1 %v1360_v0 }
  0x82   : > { %460 = vmatmul.mubr.bf16.gmra.mrb[4].mxu0 %v1185_v19  ;;  %500 = vmatmul.mubr.bf16.gmra.mrb[4].mxu1 %v1189_v20 }
  0x83   : > { %469 = vmatprep.mubr.bf16.mxu0 %v1360_v0  ;;  %509 = vmatprep.mubr.bf16.mxu1 %v1360_v0 }
  0x8a   : > { %470 = vmatmul.mubr.bf16.gmra.mrb[8].mxu0 %v1186_v21  ;;  %510 = vmatmul.mubr.bf16.gmra.mrb[8].mxu1 %v1190_v22 }
  0x8b   : > { %479 = vmatprep.mubr.bf16.mxu0 %v1360_v0  ;;  %519 = vmatprep.mubr.bf16.mxu1 %v1360_v0 }
  0x92   : > { %480 = vmatmul.mubr.bf16.gmra.mrb[12].mxu0 %v1187_v23  ;;  %520 = vmatmul.mubr.bf16.gmra.mrb[12].mxu1 %v1191_v24 }
 0x14d   : > { %v451_v31 = vpop.f32.mrb[0].mxu0  ;;  %v1562_v33 = vpop.f32.mrb[0].mxu1 }
 0x14e   : > { %v453_v34 = vpop.f32.mrb[1].mxu0  ;;  %v452_v35 = vadd.f32 %v451_v31, %v1558_v30  ;;  %v493_v36 = vpop.f32.mrb[1].mxu1 }
 0x14f   : > { %v455_v37 = vpop.f32.mrb[2].mxu0  ;;  %v494_v38 = vadd.f32 %v493_v36, %v1560_v32  ;;  %v1566_v39 = vpop.f32.mrb[2].mxu1  ;;  %v454_v42 = vadd.f32 %v453_v34, %v1560_v32 }
 0x150   : > { %v457_v40 = vpop.f32.mrb[3].mxu0  ;;  %530 = vxpose.xlu0.b32.start [1/16] %v452_v35, 128  ;;  %v497_v41 = vpop.f32.mrb[3].mxu1  ;;  %v456_v45 = vadd.f32 %v455_v37, %v1558_v30  ;;  %v492_v35 = vadd.f32 %v1562_v33, %v1558_v30  ;;  %v496_v36 = vadd.f32 %v1566_v39, %v1558_v30 }
 0x151   : > { %v458_v43 = vadd.f32 %v457_v40, %v1560_v32  ;;  %v498_v44 = vadd.f32 %v497_v41, %v1560_v32 }
 0x153   : > { %v1023_v46 = vpack.c.bf16 %v458_v43, %v454_v42  ;;  %v1043_v47 = vpack.c.bf16 %v498_v44, %v494_v38 }
 0x154   : > { %531 = vxpose.xlu0.b32.cont [2/16] %v456_v45, 128 }
 0x155   : > { %1024 = vst [vmem:[%s1573_s9] sm:$0xff] %v1023_v46   ;;  %v461_v48 = vpop.f32.mrb[4].mxu0  ;;  %1070 = vst [vmem:[%s1573_s9 + $0x20] sm:$0xff] %v1043_v47   ;;  %v501_v49 = vpop.f32.mrb[4].mxu1 }
 0x156   : > { %v462_v50 = vadd.f32 %v461_v48, %v1558_v30  ;;  %v463_v51 = vpop.f32.mrb[5].mxu0  ;;  %v503_v52 = vpop.f32.mrb[5].mxu1  ;;  %v502_v37 = vadd.f32 %v501_v49, %v1558_v30 }
 0x157   : > { %v465_v53 = vpop.f32.mrb[6].mxu0  ;;  %v504_v54 = vadd.f32 %v503_v52, %v1560_v32  ;;  %v505_v55 = vpop.f32.mrb[6].mxu1  ;;  %v464_v58 = vadd.f32 %v463_v51, %v1560_v32 }
 0x158   : > { %v467_v56 = vpop.f32.mrb[7].mxu0  ;;  %532 = vxpose.xlu0.b32.cont [3/16] %v462_v50, 128  ;;  %v507_v57 = vpop.f32.mrb[7].mxu1  ;;  %v466_v61 = vadd.f32 %v465_v53, %v1558_v30 }
 0x159   : > { %v468_v59 = vadd.f32 %v467_v56, %v1560_v32  ;;  %v508_v60 = vadd.f32 %v507_v57, %v1560_v32 }
 0x15b   : > { %v1028_v62 = vpack.c.bf16 %v468_v59, %v464_v58  ;;  %v1048_v63 = vpack.c.bf16 %v508_v60, %v504_v54 }
 0x15c   : > { %533 = vxpose.xlu0.b32.cont [4/16] %v466_v61, 128 }
 0x15d   : > { %1067 = vst [vmem:[%s1573_s9 + $0x8] sm:$0xff] %v1028_v62   ;;  %v471_v0 = vpop.f32.mrb[8].mxu0  ;;  %1071 = vst [vmem:[%s1573_s9 + $0x28] sm:$0xff] %v1048_v63   ;;  %v511_v1 = vpop.f32.mrb[8].mxu1 }
 0x15e   : > { %v472_v2 = vadd.f32 %v471_v0, %v1558_v30  ;;  %v473_v3 = vpop.f32.mrb[9].mxu0  ;;  %v513_v4 = vpop.f32.mrb[9].mxu1  ;;  %v512_v38 = vadd.f32 %v511_v1, %v1558_v30 }
 0x15f   : > { %v475_v5 = vpop.f32.mrb[10].mxu0  ;;  %v514_v6 = vadd.f32 %v513_v4, %v1560_v32  ;;  %v515_v7 = vpop.f32.mrb[10].mxu1  ;;  %v474_v10 = vadd.f32 %v473_v3, %v1560_v32 }
 0x160   : > { %v477_v8 = vpop.f32.mrb[11].mxu0  ;;  %534 = vxpose.xlu0.b32.cont [5/16] %v472_v2, 128  ;;  %v517_v9 = vpop.f32.mrb[11].mxu1  ;;  %v476_v13 = vadd.f32 %v475_v5, %v1558_v30  ;;  %v516_v33 = vadd.f32 %v515_v7, %v1558_v30 }
 0x161   : > { %v478_v11 = vadd.f32 %v477_v8, %v1560_v32  ;;  %v518_v12 = vadd.f32 %v517_v9, %v1560_v32 }
 0x163   : > { %v1033_v14 = vpack.c.bf16 %v478_v11, %v474_v10  ;;  %v1053_v15 = vpack.c.bf16 %v518_v12, %v514_v6 }
 0x164   : > { %535 = vxpose.xlu0.b32.cont [6/16] %v476_v13, 128 }
 0x165   : > { %1068 = vst [vmem:[%s1573_s9 + $0x10] sm:$0xff] %v1033_v14   ;;  %v481_v16 = vpop.f32.mrb[12].mxu0  ;;  %1072 = vst [vmem:[%s1573_s9 + $0x30] sm:$0xff] %v1053_v15   ;;  %v521_v17 = vpop.f32.mrb[12].mxu1 }
 0x166   : > { %v482_v18 = vadd.f32 %v481_v16, %v1558_v30  ;;  %v483_v19 = vpop.f32.mrb[13].mxu0  ;;  %v523_v20 = vpop.f32.mrb[13].mxu1  ;;  %v522_v40 = vadd.f32 %v521_v17, %v1558_v30 }
 0x167   : > { %v485_v21 = vpop.f32.mrb[14].mxu0  ;;  %v524_v22 = vadd.f32 %v523_v20, %v1560_v32  ;;  %v525_v23 = vpop.f32.mrb[14].mxu1  ;;  %v484_v26 = vadd.f32 %v483_v19, %v1560_v32 }
 0x168   : > { %v487_v24 = vpop.f32.mrb[15].mxu0  ;;  %536 = vxpose.xlu0.b32.cont [7/16] %v482_v18, 128  ;;  %v527_v25 = vpop.f32.mrb[15].mxu1  ;;  %v486_v29 = vadd.f32 %v485_v21, %v1558_v30  ;;  %v526_v39 = vadd.f32 %v525_v23, %v1558_v30 }
 0x169   : > { %v488_v27 = vadd.f32 %v487_v24, %v1560_v32  ;;  %v528_v28 = vadd.f32 %v527_v25, %v1560_v32  ;;  %v506_v32 = vadd.f32 %v505_v55, %v1558_v30 }
 0x16b   : > { %v1038_v31 = vpack.c.bf16 %v488_v27, %v484_v26  ;;  %v1058_v34 = vpack.c.bf16 %v528_v28, %v524_v22 }
 0x16c   : > { %537 = vxpose.xlu0.b32.cont [8/16] %v486_v29, 128 }
 0x16d   : > { %1069 = vst [vmem:[%s1573_s9 + $0x18] sm:$0xff] %v1038_v31   ;;  %1073 = vst [vmem:[%s1573_s9 + $0x38] sm:$0xff] %v1058_v34  }
 0x170   : > { %538 = vxpose.xlu0.b32.cont [9/16] %v492_v35, 128 }
 0x174   : > { %539 = vxpose.xlu0.b32.cont [10/16] %v496_v36, 128 }
 0x178   : > { %540 = vxpose.xlu0.b32.cont [11/16] %v502_v37, 128 }
 0x17c   : > { %541 = vxpose.xlu0.b32.cont [12/16] %v506_v32, 128 }
 0x180   : > { %542 = vxpose.xlu0.b32.cont [13/16] %v512_v38, 128 }
 0x184   : > { %543 = vxpose.xlu0.b32.cont [14/16] %v516_v33, 128 }
 0x188   : > { %544 = vxpose.xlu0.b32.cont [15/16] %v522_v40, 128 }
 0x18c   : > { %545 = vxpose.xlu0.b32.end [16/16] %v526_v39, 128 }
 0x18d   : > { %1263 = shalt.err (!%p1260_p7)
}
 0x18e   : > { %s1264_s14 = scalar_lea.hbm %s1618_s5, 1024  ;;  %s1268_s23 = scalar_lea.hbm %s1714_s4, 8192 }
 0x18f   : > { %p1265_p9 = scmp.ne.s32.totalorder %s1618_s5, %s1264_s14  ;;  %p1269_p5 = scmp.lt.u32.totalorder %s1618_s5, %s1714_s4 }
 0x190   : > { %p1270_p10 = scmp.lt.u32.totalorder %s1268_s23, %s1264_s14  ;;  %p1272_p1 = scmp.lt.u32.totalorder %s1264_s14, %s1618_s5 }
 0x191   : > { %p1266_p11 = pnand %p1265_p9, %p1474_p12 }
 0x192   : > { %p1271_p2 = por %p1270_p10, %p1269_p5 }
 0x193   : > { %p1267_p0 = pneg %p1266_p11 }
 0x194   : > { %p1273_p4 = por %p1272_p1, %p1271_p2 }
 0x196   : > { %p1274_p6 = pnand %p1273_p4, %p1267_p0 }
 0x198   : > { %1277 = shalt.err (!%p1274_p6)
}
 0x199   : > { %s1362_s10 = smov 64   ;;  %s1363_s6 = smov 4  }
 0x19a   : > { %1097 = dma.vmem_to_hbm [thread:$0]  (%p1474_p12), %s1613_s28, 1024, %s1618_s5, %s728_s7, %s1362_s10, %s1362_s10, %s1363_s6  }
 0x19b   : > { %s1648_s26 = scalar_lea.vmem [#allocation7], %s1525_s13  ;;  %s941_s28 = sshll.u32 %s1412_s19, 6 }
 0x19c   : > { %s740_s13 = sshll.u32 %s1648_s26, 4  ;;  %s1664_s8 = scalar_lea.hbm %s1713_s3, %s941_s28  ;;  %s1659_s13 = int_to_ptr.vmem [resolvable:$true] %s740_s13 }
 0x19d   : > { %s723_s25 = scalar_lea.sflag [#allocation4], %s1522_s12  ;;  %s1278_s11 = scalar_lea.vmem %s1659_s13, 1024 }
 0x19e   : > { %p1279_p8 = scmp.ne.s32.totalorder %s1659_s13, %s1278_s11  ;;  %s1364_s19 = smov [#allocation7]  }
 0x19f   : > { %s1282_s14 = sshll.u32 %s1364_s19, 4  ;;  %s1283_s14 = int_to_ptr.vmem [resolvable:$false] %s1282_s14 }
 0x1a0   : > { %p1280_p13 = pnand %p1279_p8, %p1474_p12  ;;  %s1284_s20 = scalar_lea.vmem %s1283_s14, 2048 }
 0x1a1   : > { %p1285_p7 = scmp.lt.s32.totalorder %s1659_s13, %s1283_s14  ;;  %p1286_p9 = scmp.lt.s32.totalorder %s1284_s20, %s1278_s11 }
 0x1a2   : > { %p1281_p3 = pneg %p1280_p13 }
 0x1a3   : > { %p1287_p11 = por %p1286_p9, %p1285_p7 }
 0x1a5   : > { %p1288_p0 = pnand %p1287_p11, %p1281_p3 }
 0x1d0   : > { %v546_v30 = vpop.trf.xlu0 }
 0x1d4   : > { %v547_v41 = vpop.trf.xlu0 }
 0x1d5   : > { %v983_v42 = vpack.c.bf16 %v547_v41, %v546_v30 }
 0x1d7   : > { %984 = vst [vmem:[%s1648_s26] sm:$0xff] %v983_v42  }
 0x1d8   : > { %v548_v43 = vpop.trf.xlu0 }
 0x1dc   : > { %v549_v44 = vpop.trf.xlu0 }
 0x1dd   : > { %v988_v45 = vpack.c.bf16 %v549_v44, %v548_v43 }
 0x1df   : > { %1060 = vst [vmem:[%s1648_s26 + $0x8] sm:$0xff] %v988_v45  }
 0x1e0   : > { %v550_v46 = vpop.trf.xlu0 }
 0x1e4   : > { %v551_v47 = vpop.trf.xlu0 }
 0x1e5   : > { %v993_v48 = vpack.c.bf16 %v551_v47, %v550_v46 }
 0x1e7   : > { %1061 = vst [vmem:[%s1648_s26 + $0x10] sm:$0xff] %v993_v48  }
 0x1e8   : > { %v552_v49 = vpop.trf.xlu0 }
 0x1ec   : > { %v553_v50 = vpop.trf.xlu0 }
 0x1ed   : > { %v998_v51 = vpack.c.bf16 %v553_v50, %v552_v49 }
 0x1ef   : > { %1062 = vst [vmem:[%s1648_s26 + $0x18] sm:$0xff] %v998_v51  }
 0x1f0   : > { %v554_v52 = vpop.trf.xlu0 }
 0x1f4   : > { %v555_v53 = vpop.trf.xlu0 }
 0x1f5   : > { %v1003_v54 = vpack.c.bf16 %v555_v53, %v554_v52 }
 0x1f7   : > { %1063 = vst [vmem:[%s1648_s26 + $0x20] sm:$0xff] %v1003_v54  }
 0x1f8   : > { %v556_v55 = vpop.trf.xlu0 }
 0x1fc   : > { %v557_v56 = vpop.trf.xlu0 }
 0x1fd   : > { %v1008_v57 = vpack.c.bf16 %v557_v56, %v556_v55 }
 0x1ff   : > { %1064 = vst [vmem:[%s1648_s26 + $0x28] sm:$0xff] %v1008_v57  }
 0x200   : > { %v558_v58 = vpop.trf.xlu0 }
 0x204   : > { %v559_v59 = vpop.trf.xlu0 }
 0x205   : > { %v1013_v60 = vpack.c.bf16 %v559_v59, %v558_v58 }
 0x207   : > { %1065 = vst [vmem:[%s1648_s26 + $0x30] sm:$0xff] %v1013_v60  }
 0x208   : > { %v560_v61 = vpop.trf.xlu0 }
 0x20c   : > { %v561_v62 = vpop.trf.xlu0 }
 0x20d   : > { %v1018_v63 = vpack.c.bf16 %v561_v62, %v560_v61 }
 0x20f   : > { %1066 = vst [vmem:[%s1648_s26 + $0x38] sm:$0xff] %v1018_v63  }
 0x210   : > { %1291 = shalt.err (!%p1288_p0)
}
 0x211   : > { %s1292_s21 = scalar_lea.hbm %s1664_s8, 1024  ;;  %s1296_s29 = scalar_lea.hbm %s1713_s3, 8192 }
 0x212   : > { %p1293_p5 = scmp.ne.s32.totalorder %s1664_s8, %s1292_s21  ;;  %p1297_p1 = scmp.lt.u32.totalorder %s1664_s8, %s1713_s3 }
 0x213   : > { %p1298_p4 = scmp.lt.u32.totalorder %s1296_s29, %s1292_s21  ;;  %p1300_p8 = scmp.lt.u32.totalorder %s1292_s21, %s1664_s8 }
 0x214   : > { %p1294_p10 = pnand %p1293_p5, %p1474_p12 }
 0x215   : > { %p1299_p6 = por %p1298_p4, %p1297_p1 }
 0x216   : > { %p1295_p2 = pneg %p1294_p10 }
 0x217   : > { %p1301_p13 = por %p1300_p8, %p1299_p6 }
 0x219   : > { %p1302_p3 = pnand %p1301_p13, %p1295_p2 }
 0x21b   : > { %1305 = shalt.err (!%p1302_p3)
}
 0x21c   : > { %s1365_s5 = smov 512  }
 0x21d   : > { %1096 = dma.vmem_to_hbm [thread:$0]  (%p1474_p12), %s1659_s13, 1024, %s1664_s8, %s723_s25, %s1362_s10, %s1365_s5, %s1363_s6  }
 0x21e PF: > { %p1118_p7 = scmp.ge.s32.totalorder %s1352_s18, 2  ;;  %s771_s7 = sand.u32 1, %s1340_s15  }
 0x21f   : > { %p1729_p9 = scmp.ne.s32.totalorder %s1719_s22, 0  ;;  %s772_s11 = scalar_lea.sflag [#allocation4], %s771_s7 }
 0x221   : > { %p1109_p11 = pnand %p1118_p7, %p1729_p9 }
 0x223   : > { %1331 = dma.done.wait (!%p1109_p11), %s772_s11, 1024  }
 0x224   : > { %1333 = vsyncadd (!%p1109_p11), %s772_s11, 4294966272  ;;  %s781_s19 = scalar_lea.sflag [#allocation9], %s771_s7 }
 0x225   : > { %1335 = dma.done.wait (!%p1109_p11), %s781_s19, 1024  }
 0x226   : > { %1337 = vsyncadd (!%p1109_p11), %s781_s19, 4294966272  ;;  %p22_p12 = scmp.ge.s32.totalorder %s1444_s27, 10   ;;  %s1730_s15 = smov %s1344_s16 }
 0x227   : > { %s1731_s16 = smov %s1348_s17  ;;  %s1732_s17 = smov %s1470_s24 }
 0x228   : > { %s1733_s18 = smov %s1444_s27  ;;  %24 = sbr.rel (!%p22_p12) target bundleno = 8 (0x8), region = 98 }
 0x22f   :  { %786 = vsyncpa [#allocation3], 1 }
 0x230   :  { %788 = vsyncpa [#allocation3 + $0x1], 1 }
 0x231   :  { %789 = vsyncpa [#allocation6], 1 }
 0x232   :  { %790 = vsyncpa [#allocation4], 1 }
 0x233   :  { %792 = vsyncpa [#allocation4 + $0x1], 1 }
 0x234   :  { %793 = vsyncpa [#allocation9], 1 }
 0x235   :  { %795 = vsyncpa [#allocation9 + $0x1], 1 }

</bundles_post_ra>
